<compile_context>
chip_gen: v6e
topology: v6e:2x2x1
jax: 0.10.0
libtpu: 0.0.40
codegen_flags: <defaults>
</compile_context>

<pallas_src>
import functools

import jax
import jax.numpy as jnp
from jax.experimental import pallas as pl
from jax.experimental.pallas import tpu as pltpu


# ----------------------------- kernel ---------------------------------------


def _logreg_kernel(x_ref, wt_ref, b_ref, probas_ref, logits_ref, *, compute_dtype):
    # x_ref: (tb, F) caller dtype | wt_ref: (F, C) weight dtype | b_ref: (1, C) f32
    xv = x_ref[...].astype(compute_dtype)       # in-kernel `x.float()` (or bf16 opt-in)
    wv = wt_ref[...].astype(compute_dtype)
    logits = jnp.dot(xv, wv, preferred_element_type=jnp.float32) + b_ref[...]
    # sigmoid = 1 / (1 + exp(-z)): exp + reciprocal go to the EUP slot (free while HBM-bound).
    probas = pl.reciprocal(1.0 + jnp.exp(-logits), approx=False)
    logits_ref[...] = logits.astype(logits_ref.dtype)
    probas_ref[...] = probas.astype(probas_ref.dtype)


# ----------------------------- tiling helpers --------------------------------


def _round_down(x, m):
    return (x // m) * m


def _vmem_capacity_bytes():
    """Physical VMEM per TensorCore; conservative (v7x-sized) fallback."""
    try:
        cap = int(getattr(pltpu.get_tpu_info(), "vmem_capacity_bytes"))
        if cap > 0:
            return cap
    except Exception:
        pass
    return 64 * 1024 * 1024


def _tile_vmem_bytes(tb, F, C, x_bytes, w_bytes, out_bytes):
    """Honest (double-buffered) VMEM footprint of one pipeline stage."""
    c_lanes = max(C, 128)  # VMEM buffers are lane-padded physically
    return (
        2 * tb * F * x_bytes              # x tile, double-buffered
        + 2 * F * c_lanes * w_bytes       # W^T: Pallas allocates 2 buffers even w/ const map
        + 2 * 1 * c_lanes * 4             # bias
        + 2 * 2 * tb * c_lanes * out_bytes  # two outputs, double-buffered
    )


def _pick_batch_tile(B, F, C, x_bytes, w_bytes, out_bytes, budget_bytes):
    """Largest batch tile (multiple of 256, <= 1024, <= B) fitting the VMEM budget."""
    if B <= 256:
        return B  # single full-extent tile; exempt from the sublane-multiple rule
    tb = min(1024, _round_down(B, 256))
    while tb > 256 and _tile_vmem_bytes(tb, F, C, x_bytes, w_bytes, out_bytes) > budget_bytes:
        tb = max(256, _round_down(tb // 2, 256))
    # TODO(synk): add an F (reduction) grid axis with an f32 VMEM accumulator for very
    # large F where the resident W^T alone exceeds the budget; today we only shrink tb.
    # Ensure >=2 grid steps when the batch allows it, so v7x's 2nd TensorCore gets work.
    if B >= 512:
        tb = min(tb, max(256, _round_down(pl.cdiv(B, 2), 256)))
    return tb


# ----------------------------- wrapper ---------------------------------------


def logreg_forward(x, weight, bias, *, compute_dtype=jnp.float32, out_dtype=jnp.float32):
    """Pallas equivalent of logReg.forward.

    Args:
      x:      [B, F] (any float dtype; cast to compute_dtype in-kernel, matching x.float()).
      weight: [C, F] (PyTorch nn.Linear layout).
      bias:   [C].
      compute_dtype: matmul-input dtype. f32 matches the PyTorch module exactly;
        jnp.bfloat16 halves x/W read bytes (opt-in, f32 accumulation kept).
      out_dtype: output dtype (f32 matches the FloatTensor contract).
    Returns:
      (probas, logits), both [B, C] — same order as the PyTorch module.
    """
    B, F = x.shape
    C, F2 = weight.shape
    assert F == F2, "weight must be [num_classes, num_features]"

    x_bytes = jnp.dtype(x.dtype).itemsize
    w_bytes = jnp.dtype(weight.dtype).itemsize
    out_bytes = jnp.dtype(out_dtype).itemsize

    # One-time tiny wrapper ops on the small operands (W, b); x is untouched.
    w_t = weight.T                                   # [F, C] -> transpose-free MXU operand
    b2d = bias.astype(jnp.float32).reshape(1, C)

    # Generation-aware VMEM budgeting (v5e/v6e: 128 MiB, v7x: 64 MiB per core).
    vmem_cap = _vmem_capacity_bytes()
    budget = int(0.45 * vmem_cap)
    tb = _pick_batch_tile(B, F, C, x_bytes, w_bytes, out_bytes, budget)
    grid = (pl.cdiv(B, tb),)

    est_vmem = _tile_vmem_bytes(tb, F, C, x_bytes, w_bytes, out_bytes)
    vmem_limit = int(min(max(2 * est_vmem, 32 * 1024 * 1024), int(0.75 * vmem_cap)))

    cost = pl.CostEstimate(
        flops=2 * B * F * C,
        transcendentals=B * C,                       # sigmoid exp
        bytes_accessed=(
            B * F * x_bytes                          # x read (original dtype)
            + F * C * w_bytes                        # W read (resident)
            + C * 4                                  # bias read
            + 2 * B * C * out_bytes                  # probas + logits writes (true C, no pad)
        ),
    )

    kernel = functools.partial(_logreg_kernel, compute_dtype=compute_dtype)

    probas, logits = pl.pallas_call(
        kernel,
        out_shape=(
            jax.ShapeDtypeStruct((B, C), out_dtype),
            jax.ShapeDtypeStruct((B, C), out_dtype),
        ),
        grid_spec=pltpu.PrefetchScalarGridSpec(
            num_scalar_prefetch=0,
            grid=grid,
            in_specs=[
                pl.BlockSpec((tb, F), lambda i: (i, 0)),   # x: tiled over batch
                pl.BlockSpec((F, C), lambda i: (0, 0)),    # W^T: resident in VMEM
                pl.BlockSpec((1, C), lambda i: (0, 0)),    # bias: resident
            ],
            out_specs=[
                pl.BlockSpec((tb, C), lambda i: (i, 0)),   # probas (true C, no lane pad)
                pl.BlockSpec((tb, C), lambda i: (i, 0)),   # logits
            ],
        ),
        compiler_params=pltpu.CompilerParams(
            dimension_semantics=("parallel",),             # megacore sharding on v7x
            vmem_limit_bytes=vmem_limit,
        ),
        cost_estimate=cost,
    )(x, w_t, b2d)

    return probas, logits


def init_logreg_params(key, num_features, num_classes):
    """Init mimicking torch.nn.Linear default: U(-1/sqrt(F), 1/sqrt(F))."""
    kw, kb = jax.random.split(key)
    bound = 1.0 / jnp.sqrt(jnp.float32(num_features))
    weight = jax.random.uniform(
        kw, (num_classes, num_features), jnp.float32, -bound, bound
    )
    bias = jax.random.uniform(kb, (num_classes,), jnp.float32, -bound, bound)
    return weight, bias


if __name__ == "__main__":
    key = jax.random.PRNGKey(0)
    kx, kp = jax.random.split(key)

    batch = 8
    num_features = 32
    num_classes = 8

    x = jax.random.normal(kx, (batch, num_features), jnp.float32)
    weight, bias = init_logreg_params(kp, num_features, num_classes)

    probas, logits = logreg_forward(x, weight, bias)
    jax.block_until_ready((probas, logits))

    # Sanity check against plain-JAX reference (matches the PyTorch forward).
    ref_logits = x.astype(jnp.float32) @ weight.T + bias
    ref_probas = jax.nn.sigmoid(ref_logits)
    assert probas.shape == (batch, num_classes)
    assert logits.shape == (batch, num_classes)
    assert jnp.allclose(logits, ref_logits, atol=1e-5, rtol=1e-5)
    assert jnp.allclose(probas, ref_probas, atol=1e-5, rtol=1e-5)

    print("KERNEL_OK")
</pallas_src>

<mosaic_0001>
module attributes {stable_mosaic.version = 11 : i64} {
  func.func @_logreg_kernel(%arg0: i32, %arg1: memref<8x32xf32, #tpu.memory_space<vmem>>, %arg2: memref<32x8xf32, #tpu.memory_space<vmem>>, %arg3: memref<1x8xf32, #tpu.memory_space<vmem>>, %arg4: memref<8x8xf32, #tpu.memory_space<vmem>>, %arg5: memref<8x8xf32, #tpu.memory_space<vmem>>) attributes {dimension_semantics = [#tpu.dimension_semantics<parallel>], iteration_bounds = array<i64: 1>, scalar_prefetch = 0 : i64, scratch_operands = 0 : i64, tpu.core_type = #tpu.core_type<tc>, window_params = [{transform_indices = @transform_0, window_bounds = array<i64: 8, 32>}, {pipeline_mode = #tpu.pipeline_mode<synchronous>, transform_indices = @transform_1, window_bounds = array<i64: 32, 8>}, {pipeline_mode = #tpu.pipeline_mode<synchronous>, transform_indices = @transform_2, window_bounds = array<i64: 1, 8>}, {transform_indices = @transform_3, window_bounds = array<i64: 8, 8>}, {transform_indices = @transform_4, window_bounds = array<i64: 8, 8>}]} {
    %c0 = arith.constant 0 : index
    %c0_0 = arith.constant 0 : index
    %0 = vector.load %arg1[%c0, %c0_0] : memref<8x32xf32, #tpu.memory_space<vmem>>, vector<8x32xf32>
    %c0_1 = arith.constant 0 : index
    %c0_2 = arith.constant 0 : index
    %1 = vector.load %arg2[%c0_1, %c0_2] : memref<32x8xf32, #tpu.memory_space<vmem>>, vector<32x8xf32>
    %cst = arith.constant dense<0.000000e+00> : vector<8x8xf32>
    %2 = tpu.matmul %0, %1, %cst {dimension_numbers = #tpu.dot_dimension_numbers<[1], [0], [0], [1], [0, 0, 1, 1], [], []>} : vector<8x32xf32>, vector<32x8xf32>, vector<8x8xf32> -> vector<8x8xf32>
    %c0_3 = arith.constant 0 : index
    %c0_4 = arith.constant 0 : index
    %3 = vector.load %arg3[%c0_3, %c0_4] : memref<1x8xf32, #tpu.memory_space<vmem>>, vector<1x8xf32>
    %4 = vector.broadcast %3 : vector<1x8xf32> to vector<8x8xf32>
    %5 = arith.addf %2, %4 : vector<8x8xf32>
    %cst_5 = arith.constant 0.000000e+00 : f32
    %6 = vector.broadcast %cst_5 : f32 to vector<8x8xf32>
    %7 = arith.subf %6, %5 : vector<8x8xf32>
    %8 = math.exp %7 : vector<8x8xf32>
    %cst_6 = arith.constant 1.000000e+00 : f32
    %9 = vector.broadcast %cst_6 : f32 to vector<8x8xf32>
    %10 = arith.addf %9, %8 : vector<8x8xf32>
    %11 = tpu.reciprocal %10 : vector<8x8xf32> -> vector<8x8xf32>
    %c0_7 = arith.constant 0 : index
    %c0_8 = arith.constant 0 : index
    %12 = vector.load %arg5[%c0_7, %c0_8] : memref<8x8xf32, #tpu.memory_space<vmem>>, vector<8x8xf32>
    tpu.vector_store %arg5[%c0_7, %c0_8], %5 {strides = array<i32>} : memref<8x8xf32, #tpu.memory_space<vmem>>, vector<8x8xf32>,
    %c0_9 = arith.constant 0 : index
    %c0_10 = arith.constant 0 : index
    %13 = vector.load %arg4[%c0_9, %c0_10] : memref<8x8xf32, #tpu.memory_space<vmem>>, vector<8x8xf32>
    tpu.vector_store %arg4[%c0_9, %c0_10], %11 {strides = array<i32>} : memref<8x8xf32, #tpu.memory_space<vmem>>, vector<8x8xf32>,
    return
  }
  func.func @transform_0(%arg0: i32) -> (i32, i32) {
    %c0_i32 = arith.constant 0 : i32
    %c0_i32_0 = arith.constant 0 : i32
    return %arg0, %c0_i32 : i32, i32
  }
  func.func @transform_1(%arg0: i32) -> (i32, i32) {
    %c0_i32 = arith.constant 0 : i32
    %c0_i32_0 = arith.constant 0 : i32
    %c0_i32_1 = arith.constant 0 : i32
    return %c0_i32, %c0_i32_0 : i32, i32
  }
  func.func @transform_2(%arg0: i32) -> (i32, i32) {
    %c0_i32 = arith.constant 0 : i32
    %c0_i32_0 = arith.constant 0 : i32
    %c0_i32_1 = arith.constant 0 : i32
    return %c0_i32, %c0_i32_0 : i32, i32
  }
  func.func @transform_3(%arg0: i32) -> (i32, i32) {
    %c0_i32 = arith.constant 0 : i32
    %c0_i32_0 = arith.constant 0 : i32
    return %arg0, %c0_i32 : i32, i32
  }
  func.func @transform_4(%arg0: i32) -> (i32, i32) {
    %c0_i32 = arith.constant 0 : i32
    %c0_i32_0 = arith.constant 0 : i32
    return %arg0, %c0_i32 : i32, i32
  }
}

</mosaic_0001>

<bundles_post_ra>
// kernel: tpu_custom_call.1
= control target key start
LH: loop header
LB: loop body
LE: loop exit
PB: predicated region body
PF: predicated region fallthrough
CT: control target
= control target key end

     0   :  { %10 = vsyncpa [#allocation3], 0  ;;  %v210_v1 = vmov 0.0   ;;  %vm211_vm0 = vmmov 0   ;;  %s265_s0 = inlined_call_operand.vmem [shape: f32[8,32], index: 0, kind: input, shape index: {}]   ;;  %s266_s1 = inlined_call_operand.vmem [shape: f32[32,8], index: 1, kind: input, shape index: {}]   ;;  %s267_s2 = inlined_call_operand.vmem [shape: f32[1,8], index: 2, kind: input, shape index: {}]   ;;  %s268_s3 = inlined_call_operand.hbm [shape: f32[8,8], index: 3, kind: output, shape index: {0}]   ;;  %s269_s4 = inlined_call_operand.hbm [shape: f32[8,8], index: 4, kind: output, shape index: {1}]  }
   0x1   :  { %v22_v0 = vld [vmem:[%s266_s1 + $0x18] sm:$0xff]  ;;  %147 = vmatprep.subr.mxu0 %v210_v1  ;;  %v21_v2 = vld [vmem:[%s266_s1 + $0x10] sm:$0xff]  ;;  %155 = vmatprep.mubr.msk.f32.mxu0 %vm211_vm0, %v210_v1 }
   0x2   :  { %148 = vmatpush3.msra.mxu0 %v22_v0 }
   0x3   :  { %11 = vsyncpa [#allocation5], 0  ;;  %149 = vmatprep.subr.mxu0 %v210_v1  ;;  %v20_v3 = vld [vmem:[%s266_s1 + $0x8] sm:$0xff]  ;;  %v19_v4 = vld [vmem:[%s266_s1] sm:$0xff]  ;;  %vm30_vm1 = vcmask 261120   ;;  %s212_s27 = smov [#allocation4]  }
   0x4   :  { %150 = vmatpush3.msra.mxu0 %v21_v2  ;;  %v18_v5 = vld [vmem:[%s265_s0] sm:$0xff]  ;;  %s128_s28 = sshll.u32 %s212_s27, 4  ;;  %vm109_vm2 = vcmask 64512   ;;  %s129_s28 = int_to_ptr.vmem [resolvable:$true] %s128_s28 }
   0x5   :  { %151 = vmatprep.subr.mxu0 %v210_v1  ;;  %v140_v6 = vld [vmem:[%s267_s2] ss:$0 sm:$0xff]  ;;  %s166_s1 = scalar_lea.vmem %s129_s28, 128  ;;  %p171_p1 = scmp.lt.s32.totalorder %s129_s28, %s129_s28 }
   0x6   :  { %152 = vmatpush3.msra.mxu0 %v20_v3  ;;  %p167_p0 = scmp.ne.s32.totalorder %s129_s28, %s166_s1  ;;  %p172_p2 = scmp.lt.s32.totalorder %s166_s1, %s166_s1 }
   0x7   :  { %153 = vmatprep.subr.mxu0 %v210_v1 }
   0x8   :  { %154 = vmatpush3.msra.mxu0 %v19_v4  ;;  %p173_p3 = por %p172_p2, %p171_p1 }
   0x9   :  { %156 = vmatmul.mubr.msk.f32.vlgmr.msra.gmra.mxu0 %vm30_vm1, %v18_v5 }
   0xa   :  { %p174_p4 = pnand %p173_p3, %p167_p0 }
  0xc9   :  { %v100_v7 = vpop.f32.mrf.mxu0 }
  0xca   :  { %v101_v8 = vadd.f32 %v140_v6, %v100_v7 }
  0xcb   :  { %v157_v9 = vpop.f32.mrf.mxu0 }
  0xcc   :  { %v104_v10 = vsub.f32 0.0, %v101_v8  ;;  %110 = vst.msk [vmem:[#allocation4] sm:$0xff] %vm109_vm2, %v101_v8 }
  0xcd   :  { %177 = shalt.err (!%p174_p4)
}
  0xce   :  { %131 = dma.vmem_to_hbm [thread:$0]  %s129_s28, 128, %s269_s4, [#allocation5]   ;;  %v105_v11 = vmul.f32 1.442695, %v104_v10 }
  0xcf   :  { %s213_s2 = smov [#allocation2]  }
  0xd0   :  { %162 = vpow2.f32 %v105_v11  ;;  %s118_s30 = sshll.u32 %s213_s2, 4  ;;  %s119_s30 = int_to_ptr.vmem [resolvable:$true] %s118_s30 }
  0xd1   :  { %s186_s5 = scalar_lea.vmem %s119_s30, 128  ;;  %p191_p6 = scmp.lt.s32.totalorder %s119_s30, %s119_s30 }
  0xd2   :  { %p187_p5 = scmp.ne.s32.totalorder %s119_s30, %s186_s5  ;;  %p192_p7 = scmp.lt.s32.totalorder %s186_s5, %s186_s5 }
  0xd4   :  { %p193_p8 = por %p192_p7, %p191_p6 }
  0xd6   :  { %p194_p9 = pnand %p193_p8, %p187_p5 }
  0xdd   :  { %v163_v12 = vpop.eup %162 }
  0xde   :  { %v107_v13 = vadd.f32 1.0, %v163_v12 }
  0xe0   :  { %164 = vrcp.f32 %v107_v13 }
  0xed   :  { %v165_v14 = vpop.eup %164 }
  0xee   :  { %111 = vst.msk [vmem:[#allocation2] sm:$0xff] %vm109_vm2, %v165_v14 }
  0xef   :  { %197 = shalt.err (!%p194_p9)
}
  0xf0   :  { %121 = dma.vmem_to_hbm [thread:$0]  %s119_s30, 128, %s268_s3, [#allocation3]  }
  0xf1   :  { %206 = dma.done.wait [#allocation3], 128  }
  0xf2   :  { %207 = vsyncadd [#allocation3], 4294967168 }
  0xf3   :  { %208 = dma.done.wait [#allocation5], 128  }
  0xf4   :  { %209 = vsyncadd [#allocation5], 4294967168 }
  0xf5   :  { %138 = vsyncpa [#allocation3], 1 }
  0xf6   :  { %139 = vsyncpa [#allocation5], 1 }

</bundles_post_ra>
